<compile_context>
chip_gen: v7x
topology: tpu7x:2x2x1
jax: 0.10.0
libtpu: 0.0.40
codegen_flags: <defaults>
</compile_context>

<pallas_src>
import functools

import jax
import jax.numpy as jnp
from jax.experimental import pallas as pl
from jax.experimental.pallas import tpu as pltpu


def _make_routing_kernel(tile_hw: int, slab: int, hw: int, inv_hw: float,
                         needs_mask: bool, unroll: int):
    """tile_hw: lanes per grid step; slab: accumulator width; hw: true H*W."""
    n_slabs = tile_hw // slab

    def kernel(x_ref, w_ref, b_ref, o_ref, acc_ref):
        # x_ref: (C, TILE_HW)  w_ref: (C, E)  b_ref: (1, E)  o_ref: (1, E)
        # acc_ref: (C, SLAB) f32 lane-wide partial-sum accumulator (persists across grid).
        k = pl.program_id(0)
        last = pl.num_programs(0) - 1

        @pl.when(k == 0)
        def _init():
            acc_ref[...] = jnp.zeros_like(acc_ref)

        c = acc_ref.shape[0]
        # Hoisted constant (JAX does not CSE broadcast_in_dim inside loops).
        lane_iota = jax.lax.broadcasted_iota(jnp.int32, (c, slab), 1)

        def accumulate(masked):
            def body(j, acc):
                start = pl.multiple_of(j * slab, 128)
                chunk = x_ref[:, pl.ds(start, slab)].astype(jnp.float32)
                if masked:
                    # Global spatial index of each lane; zero anything past the true H*W
                    # (the last block may extend past the array -> undefined VMEM lanes).
                    idx = k * tile_hw + start + lane_iota
                    chunk = jnp.where(idx < hw, chunk, 0.0)
                return acc + chunk
            return jax.lax.fori_loop(0, n_slabs, body, acc_ref[...], unroll=unroll)

        if needs_mask:
            # Only the last grid step can hold out-of-bounds lanes; steady state is
            # mask-free pure VPU accumulation.
            @pl.when(k != last)
            def _steady():
                acc_ref[...] = accumulate(False)

            @pl.when(k == last)
            def _tail():
                acc_ref[...] = accumulate(True)
        else:
            acc_ref[...] = accumulate(False)

        @pl.when(k == last)
        def _finalize():
            # Single cross-lane (XLU) reduce + mean scale.
            pooled = jnp.sum(acc_ref[...], axis=1, keepdims=True) * inv_hw      # (C, 1)
            # Tiny FC as broadcast-mul + sublane reduce: avoids a degenerate MXU op and
            # any transpose; output lands directly as (1, E).
            logits = jnp.sum(pooled * w_ref[...].astype(jnp.float32),
                             axis=0, keepdims=True)                              # (1, E)
            o_ref[...] = jax.nn.sigmoid(logits + b_ref[...].astype(jnp.float32))

    return kernel


@functools.partial(jax.jit, static_argnames=("max_tile_bytes",))
def routing_forward(x, fc_weight, fc_bias, *, max_tile_bytes=4 << 20):
    """x: (1, C, H, W); fc_weight: (E, C); fc_bias: (E,). Returns (E,) f32."""
    n, c, h, w = x.shape
    assert n == 1, "torch.flatten + nn.Linear(c_in, E) semantics require batch == 1"
    hw = h * w
    e = fc_weight.shape[0]

    x2d = x.reshape(c, hw)     # metadata reshape only; ragged tail handled in-kernel
    itemsize = jnp.dtype(x2d.dtype).itemsize

    # ---- spatial tile sizing (byte-based, generation-safe) -----------------------
    # One buffer of ~4 MiB keeps the per-grid-step overhead negligible at HBM roofline,
    # and double-buffered tiles stay far below v7x's 64 MiB physical VMEM.
    max_tile_bytes = int(min(max(max_tile_bytes, 128 * c * itemsize), 8 << 20))
    tile_lanes = max(128, (max_tile_bytes // (c * itemsize)) // 128 * 128)
    tile_hw = int(min(tile_lanes, pl.cdiv(hw, 128) * 128))

    # Inner accumulation slab: <= 512 lanes, capped so the f32 accumulator scratch
    # stays small (~<=128 KiB) even for very wide C.
    slab = max(128, min(512, ((128 << 10) // (c * 4)) // 128 * 128))
    if tile_hw > slab:
        tile_hw = (tile_hw // slab) * slab     # slab must divide the tile
    else:
        slab = tile_hw

    num_tiles = int(pl.cdiv(hw, tile_hw))
    needs_mask = (hw % tile_hw) != 0           # no jnp.pad: mask last tile in-kernel
    n_slabs = tile_hw // slab
    unroll = int(min(8, n_slabs))

    # Tiny tiles: pipeline 3-deep so DMA issue latency stays hidden.
    tile_bytes = c * tile_hw * itemsize
    deep_buffer = (tile_bytes <= (512 << 10)) and (num_tiles >= 3)
    n_buffers = 3 if deep_buffer else 2
    x_spec_kwargs = dict(pipeline_mode=pl.Buffered(3)) if deep_buffer else {}
    x_spec = pl.BlockSpec((c, tile_hw), lambda k: (0, k), **x_spec_kwargs)

    # Weights/bias stay in their native dtype through the DMA; upcast happens in-kernel.
    w_t = fc_weight.T                          # (C, E): lane-contiguous output row
    b2d = fc_bias.reshape(1, e)
    w_bytes = c * e * jnp.dtype(w_t.dtype).itemsize
    b_bytes = e * jnp.dtype(b2d.dtype).itemsize

    # VMEM budget with headroom; clamped so it is valid on every generation (incl. v7x).
    vmem_need = n_buffers * tile_bytes + c * slab * 4 + 2 * (w_bytes + b_bytes) + 4 * e * 4
    vmem_limit = int(min(48 << 20, max(16 << 20, 2 * vmem_need)))

    kernel = _make_routing_kernel(tile_hw, slab, hw, 1.0 / float(hw), needs_mask, unroll)

    cost = pl.CostEstimate(
        flops=int(c * hw + 2 * c * e + e),
        transcendentals=int(e),
        bytes_accessed=int(c * hw * itemsize + w_bytes + b_bytes + e * 4),
    )

    out = pl.pallas_call(
        kernel,
        out_shape=jax.ShapeDtypeStruct((1, e), jnp.float32),
        grid_spec=pltpu.PrefetchScalarGridSpec(
            num_scalar_prefetch=0,
            grid=(num_tiles,),
            in_specs=[
                x_spec,                                       # streamed spatial tiles
                pl.BlockSpec((c, e), lambda k: (0, 0)),       # full (tiny) weight
                pl.BlockSpec((1, e), lambda k: (0, 0)),       # full (tiny) bias
            ],
            out_specs=pl.BlockSpec((1, e), lambda k: (0, 0)),
            scratch_shapes=[pltpu.VMEM((c, slab), jnp.float32)],
        ),
        compiler_params=pltpu.CompilerParams(
            dimension_semantics=("arbitrary",),   # grid axis is a reduction
            vmem_limit_bytes=vmem_limit,
        ),
        cost_estimate=cost,
    )(x2d, w_t, b2d)
    return out.reshape(e)


def routing_reference(x, fc_weight, fc_bias):
    xf = x.astype(jnp.float32)
    pooled = xf.mean(axis=2, keepdims=True).mean(axis=3, keepdims=True)
    v = pooled.reshape(-1)
    return jax.nn.sigmoid(fc_weight.astype(jnp.float32) @ v + fc_bias.astype(jnp.float32))


if __name__ == "__main__":
    # Small shapes consistent with the module: batch=1 (required), C=16, H=W=16, E=8.
    C, H, W, E = 16, 16, 16, 8
    key = jax.random.PRNGKey(0)
    kx, kw, kb = jax.random.split(key, 3)

    x = jax.random.normal(kx, (1, C, H, W), dtype=jnp.float32)

    # Deterministic nn.Linear-style init: U(-1/sqrt(c_in), 1/sqrt(c_in)).
    bound = 1.0 / (C ** 0.5)
    fc_weight = jax.random.uniform(kw, (E, C), jnp.float32, -bound, bound)
    fc_bias = jax.random.uniform(kb, (E,), jnp.float32, -bound, bound)

    out = routing_forward(x, fc_weight, fc_bias)
    jax.block_until_ready(out)
    ref = routing_reference(x, fc_weight, fc_bias)
    assert out.shape == (E,)
    assert jnp.allclose(out, ref, atol=1e-5, rtol=1e-5), (out, ref)

    # Ragged spatial size: exercises the in-kernel tail masking (no host-side pad).
    x2 = jax.random.normal(kx, (1, C, 20, 19), dtype=jnp.float32)
    out2 = routing_forward(x2, fc_weight, fc_bias)
    jax.block_until_ready(out2)
    assert jnp.allclose(out2, routing_reference(x2, fc_weight, fc_bias),
                        atol=1e-5, rtol=1e-5)

    # Multi-tile streaming + masked last tile + 3-deep buffering (force a tiny tile).
    x3 = jax.random.normal(kx, (1, C, 63, 65), dtype=jnp.float32)
    out3 = routing_forward(x3, fc_weight, fc_bias, max_tile_bytes=32 << 10)
    jax.block_until_ready(out3)
    assert jnp.allclose(out3, routing_reference(x3, fc_weight, fc_bias),
                        atol=1e-5, rtol=1e-5)

    # bf16 activations: HBM read stays narrow; upcast to f32 happens in-kernel.
    x4 = jax.random.normal(kx, (1, C, 32, 32), dtype=jnp.float32).astype(jnp.bfloat16)
    out4 = routing_forward(x4, fc_weight, fc_bias)
    jax.block_until_ready(out4)
    assert jnp.allclose(out4, routing_reference(x4, fc_weight, fc_bias),
                        atol=2e-3, rtol=2e-3)

    print("KERNEL_OK")
</pallas_src>

<mosaic_0001>
module attributes {stable_mosaic.version = 11 : i64} {
  func.func @kernel(%arg0: i32, %arg1: memref<16x256xf32, #tpu.memory_space<vmem>>, %arg2: memref<16x8xf32, #tpu.memory_space<vmem>>, %arg3: memref<1x8xf32, #tpu.memory_space<vmem>>, %arg4: memref<1x8xf32, #tpu.memory_space<vmem>>, %arg5: memref<16x256xf32, #tpu.memory_space<vmem>>) attributes {dimension_semantics = [#tpu.dimension_semantics<arbitrary>], iteration_bounds = array<i64: 1>, scalar_prefetch = 0 : i64, scratch_operands = 1 : i64, tpu.core_type = #tpu.core_type<tc>, window_params = [{transform_indices = @transform_0, window_bounds = array<i64: 16, 256>}, {pipeline_mode = #tpu.pipeline_mode<synchronous>, transform_indices = @transform_1, window_bounds = array<i64: 16, 8>}, {pipeline_mode = #tpu.pipeline_mode<synchronous>, transform_indices = @transform_2, window_bounds = array<i64: 1, 8>}, {pipeline_mode = #tpu.pipeline_mode<synchronous>, transform_indices = @transform_3, window_bounds = array<i64: 1, 8>}]} {
    %c0_i32 = arith.constant 0 : i32
    %0 = arith.cmpi eq, %arg0, %c0_i32 : i32
    %1 = arith.extui %0 : i1 to i32
    %c0_i32_0 = arith.constant 0 : i32
    %2 = arith.cmpi ne, %1, %c0_i32_0 : i32
    scf.if %2 {
      %cst = arith.constant 0.000000e+00 : f32
      %13 = vector.broadcast %cst : f32 to vector<16x256xf32>
      %c0_8 = arith.constant 0 : index
      %c0_9 = arith.constant 0 : index
      %14 = vector.load %arg5[%c0_8, %c0_9] : memref<16x256xf32, #tpu.memory_space<vmem>>, vector<16x256xf32>
      tpu.vector_store %arg5[%c0_8, %c0_9], %13 {strides = array<i32>} : memref<16x256xf32, #tpu.memory_space<vmem>>, vector<16x256xf32>,
    } else {
    }
    %c0 = arith.constant 0 : index
    %c0_1 = arith.constant 0 : index
    %3 = vector.load %arg5[%c0, %c0_1] : memref<16x256xf32, #tpu.memory_space<vmem>>, vector<16x256xf32>
    %c0_i32_2 = arith.constant 0 : i32
    %c256_i32 = arith.constant 256 : i32
    %4 = arith.muli %c0_i32_2, %c256_i32 : i32
    %5 = tpu.assume_multiple %4, 128 : i32
    %c0_3 = arith.constant 0 : index
    %6 = arith.index_cast %5 : i32 to index
    %7 = vector.load %arg1[%c0_3, %6] : memref<16x256xf32, #tpu.memory_space<vmem>>, vector<16x256xf32>
    %8 = arith.addf %3, %7 : vector<16x256xf32>
    %c1_i32 = arith.constant 1 : i32
    %c0_4 = arith.constant 0 : index
    %c0_5 = arith.constant 0 : index
    %9 = vector.load %arg5[%c0_4, %c0_5] : memref<16x256xf32, #tpu.memory_space<vmem>>, vector<16x256xf32>
    tpu.vector_store %arg5[%c0_4, %c0_5], %8 {strides = array<i32>} : memref<16x256xf32, #tpu.memory_space<vmem>>, vector<16x256xf32>,
    %c0_i32_6 = arith.constant 0 : i32
    %10 = arith.cmpi eq, %arg0, %c0_i32_6 : i32
    %11 = arith.extui %10 : i1 to i32
    %c0_i32_7 = arith.constant 0 : i32
    %12 = arith.cmpi ne, %11, %c0_i32_7 : i32
    scf.if %12 {
      %c0_8 = arith.constant 0 : index
      %c0_9 = arith.constant 0 : index
      %13 = vector.load %arg5[%c0_8, %c0_9] : memref<16x256xf32, #tpu.memory_space<vmem>>, vector<16x256xf32>
      %cst = arith.constant dense<0.000000e+00> : vector<16xf32>
      %14 = vector.multi_reduction <add>, %13, %cst [1] : vector<16x256xf32> to vector<16xf32>
      %15 = vector.shape_cast %14 : vector<16xf32> to vector<16x1xf32>
      %cst_10 = arith.constant 3.906250e-03 : f32
      %16 = vector.broadcast %cst_10 : f32 to vector<16x1xf32>
      %17 = arith.mulf %15, %16 : vector<16x1xf32>
      %c0_11 = arith.constant 0 : index
      %c0_12 = arith.constant 0 : index
      %18 = vector.load %arg2[%c0_11, %c0_12] : memref<16x8xf32, #tpu.memory_space<vmem>>, vector<16x8xf32>
      %19 = vector.broadcast %17 : vector<16x1xf32> to vector<16x8xf32>
      %20 = arith.mulf %19, %18 : vector<16x8xf32>
      %cst_13 = arith.constant dense<0.000000e+00> : vector<8xf32>
      %21 = vector.multi_reduction <add>, %20, %cst_13 [0] : vector<16x8xf32> to vector<8xf32>
      %22 = vector.shape_cast %21 : vector<8xf32> to vector<1x8xf32>
      %c0_14 = arith.constant 0 : index
      %c0_15 = arith.constant 0 : index
      %23 = vector.load %arg3[%c0_14, %c0_15] : memref<1x8xf32, #tpu.memory_space<vmem>>, vector<1x8xf32>
      %24 = arith.addf %22, %23 : vector<1x8xf32>
      %25 = arith.negf %24 : vector<1x8xf32>
      %26 = math.exp %25 : vector<1x8xf32>
      %cst_16 = arith.constant 1.000000e+00 : f32
      %27 = vector.broadcast %cst_16 : f32 to vector<1x8xf32>
      %28 = arith.addf %27, %26 : vector<1x8xf32>
      %29 = arith.divf %27, %28 : vector<1x8xf32>
      %c0_17 = arith.constant 0 : index
      %c0_18 = arith.constant 0 : index
      %30 = vector.load %arg4[%c0_17, %c0_18] : memref<1x8xf32, #tpu.memory_space<vmem>>, vector<1x8xf32>
      tpu.vector_store %arg4[%c0_17, %c0_18], %29 {strides = array<i32>} : memref<1x8xf32, #tpu.memory_space<vmem>>, vector<1x8xf32>,
    } else {
    }
    return
  }
  func.func @transform_0(%arg0: i32) -> (i32, i32) {
    %c0_i32 = arith.constant 0 : i32
    %c0_i32_0 = arith.constant 0 : i32
    return %c0_i32, %arg0 : i32, i32
  }
  func.func @transform_1(%arg0: i32) -> (i32, i32) {
    %c0_i32 = arith.constant 0 : i32
    %c0_i32_0 = arith.constant 0 : i32
    %c0_i32_1 = arith.constant 0 : i32
    return %c0_i32, %c0_i32_0 : i32, i32
  }
  func.func @transform_2(%arg0: i32) -> (i32, i32) {
    %c0_i32 = arith.constant 0 : i32
    %c0_i32_0 = arith.constant 0 : i32
    %c0_i32_1 = arith.constant 0 : i32
    return %c0_i32, %c0_i32_0 : i32, i32
  }
  func.func @transform_3(%arg0: i32) -> (i32, i32) {
    %c0_i32 = arith.constant 0 : i32
    %c0_i32_0 = arith.constant 0 : i32
    %c0_i32_1 = arith.constant 0 : i32
    return %c0_i32, %c0_i32_0 : i32, i32
  }
}

</mosaic_0001>

<bundles_post_ra>
// kernel: routing_forward.1
= control target key start
LH: loop header
LB: loop body
LE: loop exit
PB: predicated region body
PF: predicated region fallthrough
CT: control target
= control target key end

     0   :  { %s176_s0 = inlined_call_operand.vmem [shape: f32[16,256], index: 0, kind: input, shape index: {}]   ;;  %s177_s1 = inlined_call_operand.vmem [shape: f32[16,8], index: 1, kind: input, shape index: {}]   ;;  %s178_s2 = inlined_call_operand.vmem [shape: f32[1,8], index: 2, kind: input, shape index: {}]   ;;  %s179_s3 = inlined_call_operand.hbm [shape: f32[1,8], index: 3, kind: output, shape index: {}]  }
   0x1   :  { %v27_v0 = vld [vmem:[%s176_s0] sm:$0xff]  ;;  %v28_v1 = vld [vmem:[%s176_s0 + $0x8] sm:$0xff]  ;;  %v29_v2 = vld [vmem:[%s176_s0 + $0x10] sm:$0xff] }
   0x2   :  { %v46_v3 = vadd.f32 %v28_v1, %v27_v0  ;;  %v30_v4 = vld [vmem:[%s176_s0 + $0x18] sm:$0xff] }
   0x3   :  { %8 = vsyncpa [#allocation4], 0  ;;  %v49_v5 = vadd.f32 %v30_v4, %v29_v2  ;;  %v54_v8 = vld [vmem:[%s177_s1] sm:$0xff]  ;;  %v55_v9 = vld [vmem:[%s177_s1 + $0x8] sm:$0xff]  ;;  %vm58_vm0 = vcmask 64512   ;;  %s122_s1 = smov [#allocation3]  }
   0x4   :  { %47 = vadd.xlane.f32.xlu0 %v46_v3  ;;  %v68_v22 = vld [vmem:[%s178_s2] sm:$0x1]  ;;  %s84_s25 = sshll.u32 %s122_s1, 4  ;;  %vm76_vm1 = vcmask 57344   ;;  %s85_s25 = int_to_ptr.vmem [resolvable:$true] %s84_s25 }
   0x5   :  { %s98_s26 = scalar_lea.vmem %s85_s25, 16  ;;  %s102_s27 = scalar_lea.vmem %s85_s25, 32 }
   0x6   :  { %p99_p0 = scmp.ne.s32.totalorder %s85_s25, %s98_s26  ;;  %p103_p1 = scmp.lt.s32.totalorder %s85_s25, %s85_s25 }
   0x7   :  { %p104_p2 = scmp.lt.s32.totalorder %s102_s27, %s98_s26 }
   0x8   :  { %50 = vadd.xlane.f32.xlu0 %v49_v5 }
   0x9   :  { %p105_p3 = por %p104_p2, %p103_p1 }
   0xb   :  { %p106_p4 = pnand %p105_p3, %p99_p0 }
  0x91   :  { %v48_v6 = vpop.xlane.xlu0 %47 }
  0x92   :  { %v52_v7 = vmul.f32 0.00390625, %v48_v6 }
  0x94   :  { %v56_v11 = vmul.f32 %v54_v8, %v52_v7 }
  0x95   :  { %v51_v10 = vpop.xlane.xlu0 %50 }
  0x96   :  { %v53_v12 = vmul.f32 0.00390625, %v51_v10  ;;  %v59_v14 = vsel %vm58_vm0, %v56_v11, 0.0 }
  0x98   :  { %v57_v13 = vmul.f32 %v55_v9, %v53_v12 }
  0x9a   :  { %v60_v15 = vsel %vm58_vm0, %v57_v13, 0.0 }
  0x9b   :  { %v61_v16 = vadd.f32 %v60_v15, %v59_v14 }
  0x9d   :  { %v62_v17 = vrot.slane %v61_v16, 4 }
  0x9f   :  { %v63_v18 = vadd.f32 %v62_v17, %v61_v16 }
  0xa1   :  { %v64_v19 = vrot.slane %v63_v18, 2 }
  0xa3   :  { %v65_v20 = vadd.f32 %v64_v19, %v63_v18 }
  0xa5   :  { %v66_v21 = vrot.slane %v65_v20, 1 }
  0xa7   :  { %v67_v23 = vadd.f32 %v66_v21, %v65_v20 }
  0xa9   :  { %v69_v24 = vadd.f32 %v68_v22, %v67_v23 }
  0xab   :  { %v92_v25 = vmul.f32 -1.442695, %v69_v24 }
  0xad   :  { %94 = vpow2.f32 %v92_v25 }
  0xb7   :  { %v95_v26 = vpop.eup %94 }
  0xb8   :  { %v73_v27 = vadd.f32 1.0, %v95_v26 }
  0xba   :  { %96 = vrcp.f32 %v73_v27 }
  0xc4   :  { %v97_v28 = vpop.eup %96 }
  0xc5   :  { %77 = vst.msk [vmem:[#allocation3] sm:$0x1] %vm76_vm1, %v97_v28 }
  0xc6   :  { %109 = shalt.err (!%p106_p4)
}
  0xc7   :  { %s110_s29 = scalar_lea.hbm %s179_s3, 16 }
  0xc8   :  { %p111_p5 = scmp.ne.s32.totalorder %s179_s3, %s110_s29  ;;  %p114_p6 = scmp.lt.u32.totalorder %s110_s29, %s179_s3 }
  0xca   :  { %p116_p7 = pnand %p114_p6, %p111_p5 }
  0xcc   :  { %119 = shalt.err (!%p116_p7)
}
  0xcd   :  { %87 = dma.vmem_to_hbm [thread:$0]  %s85_s25, 16, %s179_s3, [#allocation4]  }
  0xce   :  { %120 = dma.done.wait [#allocation4], 16  }
  0xcf   :  { %121 = vsyncadd [#allocation4], 4294967280 }
  0xd0   :  { %91 = vsyncpa [#allocation4], 1 }

</bundles_post_ra>
